<compile_context>
chip_gen: v7x
topology: tpu7x:2x2x1
jax: 0.10.0
libtpu: 0.0.40
codegen_flags: <defaults>
</compile_context>

<pallas_src>
import math

import jax
import jax.numpy as jnp
from jax.experimental import pallas as pl
from jax.experimental.pallas import tpu as pltpu


_LANES = 128
_SUBLANES = 8
# Per-grid-step budget for the (bf16) logit block.  The kernel's f32
# elementwise temporaries are ~4x this, so total per-step VMEM stays around
# 20-25 MiB even for big problems.
_LOGIT_BLOCK_BUDGET = 2 * 1024 * 1024
# Pad value for the flattened-logit tail:
#   bce(pad, target=0) = max(x,0) - x*0 + log1p(exp(-|x|)) = log1p(exp(-1e9)) == 0
# so padding contributes nothing and no in-kernel masking is needed.
_PAD_LOGIT = -1e9


def _ssn_kernel(x_ref, t_ref, o_ref):
    """One grid step.

    x_ref: (S, Bblk, Rblk, 128)  MC logit samples (bf16/f32)
    t_ref: (Bblk, Rblk, 128)     targets (already broadcast over classes)
    o_ref: (S, Bblk, 128)        per-(s, b) partial log-prob sums (f32)
    """
    # Row-chunk (reduction) axis is grid axis 1; init the resident accumulator.
    @pl.when(pl.program_id(1) == 0)
    def _():
        o_ref[...] = jnp.zeros_like(o_ref)

    # Upcast inside the kernel: inputs may live as bf16 in HBM (halves HBM
    # traffic); all math runs in f32.
    x = x_ref[...].astype(jnp.float32)            # (S, Bblk, Rblk, 128)
    t = t_ref[...].astype(jnp.float32)[None]      # (1, Bblk, Rblk, 128)

    # PyTorch's numerically stable binary_cross_entropy_with_logits:
    #   bce = max(x, 0) - x*t + log1p(exp(-|x|))
    bce = jnp.maximum(x, 0.0) - x * t + jnp.log1p(jnp.exp(-jnp.abs(x)))

    # log_prob = -bce; reduce over the row (sublane) axis only, keep the 128
    # lanes so the store stays lane-dense.  The final 128-wide reduction
    # happens on the tiny (S, B, 128) result in plain JAX.
    o_ref[...] += -jnp.sum(bce, axis=2)           # (S, Bblk, 128)


def _choose_tiling(S, B, Rp, esize):
    """Pick (Bblk, Rblk, Rpad) under the per-step block budget.

    Output block is (S, Bblk, 128)  -> Bblk must be == B or a multiple of 8.
    Logit  block is (S, Bblk, Rblk, 128) -> Rblk must be == Rp or a multiple of 8.
    """
    legal_b = [d for d in range(1, B + 1)
               if B % d == 0 and (d == B or d % _SUBLANES == 0)]
    bmin = min(legal_b)
    bytes_per_b_full = S * Rp * _LANES * esize

    if bmin * bytes_per_b_full <= _LOGIT_BLOCK_BUDGET:
        # Whole C*H*W per step (no row chunking); grow the batch block as far
        # as the budget allows -> few fat grid steps (single step for small
        # problems), target fetched exactly once per batch item.
        fitting = [d for d in legal_b
                   if d * bytes_per_b_full <= _LOGIT_BLOCK_BUDGET]
        return max(fitting), Rp, Rp

    # Very large C*H*W: chunk the flattened row axis (reduction axis last).
    bblk = bmin
    per_row = S * bblk * _LANES * esize
    budget_rows = max(_SUBLANES,
                      (_LOGIT_BLOCK_BUDGET // per_row) // _SUBLANES * _SUBLANES)
    rp8 = pl.cdiv(Rp, _SUBLANES) * _SUBLANES
    rblk = min(budget_rows, rp8)
    rpad = pl.cdiv(Rp, rblk) * rblk
    return bblk, rblk, rpad


def ssn_mc_loss(logit_sample, target, num_mc_samples):
    """Negative MC-integrated log-likelihood (forward of the SSN loss module).

    logit_sample: (S, B, C, H, W) MC samples of the logits (f32 or bf16).
    target:       (B, H, W)       binary targets (any float dtype).
    Returns the scalar f32 loss.
    """
    S, B, C, H, W = logit_sample.shape
    assert S == num_mc_samples
    D = C * H * W
    Rp = pl.cdiv(D, _LANES)

    esize = jnp.dtype(logit_sample.dtype).itemsize
    Bblk, Rblk, Rpad = _choose_tiling(S, B, Rp, esize)
    nb = B // Bblk
    nd = Rpad // Rblk
    Dp = Rpad * _LANES
    pad = Dp - D

    # Lane-dense layout: flatten (C,H,W) -> D, broadcast target over classes,
    # pad D so the flattened axis splits into (Rpad, 128) slabs.  Logit pad
    # value makes the padded BCE exactly 0 (see _PAD_LOGIT above).
    x = logit_sample.reshape(S, B, D)
    t = jnp.broadcast_to(target.reshape(B, 1, H * W), (B, C, H * W)).reshape(B, D)
    if pad:
        x = jnp.pad(x, ((0, 0), (0, 0), (0, pad)), constant_values=_PAD_LOGIT)
        t = jnp.pad(t, ((0, 0), (0, pad)))
    x = x.reshape(S, B, Rpad, _LANES)
    t = t.reshape(B, Rpad, _LANES)

    # VMEM estimate: double-buffered inputs + output tile + ~4 live f32 copies
    # of the upcast logit block (elementwise temporaries).
    t_esize = jnp.dtype(t.dtype).itemsize
    f32_block = S * Bblk * Rblk * _LANES * 4
    vmem_need = (2 * S * Bblk * Rblk * _LANES * esize
                 + 2 * Bblk * Rblk * _LANES * t_esize
                 + 2 * S * Bblk * _LANES * 4
                 + 4 * f32_block)
    compiler_kwargs = dict(dimension_semantics=("parallel", "arbitrary"))
    if vmem_need > 12 * 1024 * 1024:           # v5e scoped default is 16 MiB
        compiler_kwargs["vmem_limit_bytes"] = int(
            min(vmem_need + (8 << 20), 56 * 1024 * 1024))

    partial_lp = pl.pallas_call(
        _ssn_kernel,
        out_shape=jax.ShapeDtypeStruct((S, B, _LANES), jnp.float32),
        grid_spec=pltpu.PrefetchScalarGridSpec(
            num_scalar_prefetch=0,
            grid=(nb, nd),
            in_specs=[
                # all S MC samples for (Bblk batch items, Rblk rows) per step
                pl.BlockSpec((S, Bblk, Rblk, _LANES),
                             lambda bi, di: (0, bi, di, 0)),
                # target depends only on (batch block, row chunk) -> fetched
                # once per (bi, di), never re-fetched per MC sample
                pl.BlockSpec((Bblk, Rblk, _LANES), lambda bi, di: (bi, di, 0)),
            ],
            # accumulator: same output block across the reduction axis `di`
            out_specs=pl.BlockSpec((S, Bblk, _LANES), lambda bi, di: (0, bi, 0)),
        ),
        compiler_params=pltpu.CompilerParams(**compiler_kwargs),
    )(x, t)

    # Tiny O(S*B*128) epilogue in plain JAX: finish the lane reduction,
    # logsumexp over MC samples, mean over batch, negate.
    per_sample_logprob = jnp.sum(partial_lp, axis=-1)            # (S, B)
    loglikelihood = jnp.mean(
        jax.scipy.special.logsumexp(per_sample_logprob, axis=0)
        - math.log(num_mc_samples))
    return -loglikelihood


def fixed_re_parametrization_trick(mean, scale, key, num_samples):
    """Mirror of the module's fixed_re_parametrization_trick for a diagonal
    Gaussian: [mean + scale*eps, mean - scale*eps]."""
    assert num_samples % 2 == 0
    half = num_samples // 2
    eps = jax.random.normal(key, (half,) + mean.shape, dtype=mean.dtype)
    d = scale * eps
    return jnp.concatenate([d, -d], axis=0) + mean[None]


def _reference_loss(logit_sample, target, num_mc_samples):
    """Pure-JAX reference of the module's forward (for validation)."""
    S, B, C, H, W = logit_sample.shape
    x = logit_sample.astype(jnp.float32).reshape(S, B, C, H * W)
    t = target.astype(jnp.float32).reshape(1, B, 1, H * W)
    bce = jnp.maximum(x, 0.0) - x * t + jnp.log1p(jnp.exp(-jnp.abs(x)))
    lp = -bce.reshape(S, B, -1).sum(-1)
    return -jnp.mean(
        jax.scipy.special.logsumexp(lp, axis=0) - math.log(num_mc_samples))


if __name__ == "__main__":
    key = jax.random.PRNGKey(0)
    k_logits, k_target, k_scale, k_eps = jax.random.split(key, 4)

    # Small shapes consistent with the module's forward (binary segmentation).
    B, C, H, W = 2, 1, 16, 16
    S = 4                     # num_mc_samples (even, as the reparam trick requires)
    D = C * H * W

    logits = jax.random.normal(k_logits, (B, C, H, W), dtype=jnp.float32)    # NCHW
    target = jax.random.bernoulli(k_target, 0.5, (B, H, W)).astype(jnp.float32)

    # TODO(synk): torch.distributions' low-rank multivariate normal `distribution`
    # has no clean Pallas equivalent; emulate it with a deterministic diagonal
    # Gaussian over the flattened logits (mean = logits), sampled in plain JAX.
    scale = 0.1 + 0.05 * jax.nn.sigmoid(
        jax.random.normal(k_scale, (B, D), dtype=jnp.float32))
    mean = logits.reshape(B, D)
    logit_sample = fixed_re_parametrization_trick(mean, scale, k_eps, S)  # (S, B, D)
    logit_sample = logit_sample.reshape(S, B, C, H, W)

    # HBM compression: the (large) MC samples and binary target travel as bf16;
    # the kernel upcasts to f32 before any math.
    logit_sample_bf16 = logit_sample.astype(jnp.bfloat16)
    target_bf16 = target.astype(jnp.bfloat16)

    loss = jax.block_until_ready(ssn_mc_loss(logit_sample_bf16, target_bf16, S))
    assert loss.shape == () and loss.dtype == jnp.float32

    # Validate against a pure-JAX reference on the same (bf16 -> f32) inputs.
    ref = jax.block_until_ready(_reference_loss(logit_sample_bf16, target_bf16, S))
    assert jnp.allclose(loss, ref, rtol=1e-3, atol=1e-3), (loss, ref)
    print("KERNEL_OK")
</pallas_src>

<mosaic_0001>
module attributes {stable_mosaic.version = 11 : i64} {
  func.func @_ssn_kernel(%arg0: i32, %arg1: i32, %arg2: memref<4x2x2x128xbf16, #tpu.memory_space<vmem>>, %arg3: memref<2x2x128xbf16, #tpu.memory_space<vmem>>, %arg4: memref<4x2x128xf32, #tpu.memory_space<vmem>>) attributes {dimension_semantics = [#tpu.dimension_semantics<parallel>, #tpu.dimension_semantics<arbitrary>], iteration_bounds = array<i64: 1, 1>, scalar_prefetch = 0 : i64, scratch_operands = 0 : i64, tpu.core_type = #tpu.core_type<tc>, window_params = [{transform_indices = @transform_0, window_bounds = array<i64: 4, 2, 2, 128>}, {transform_indices = @transform_1, window_bounds = array<i64: 2, 2, 128>}, {transform_indices = @transform_2, window_bounds = array<i64: 4, 2, 128>}]} {
    %c0_i32 = arith.constant 0 : i32
    %0 = arith.cmpi eq, %arg1, %c0_i32 : i32
    %1 = arith.extui %0 : i1 to i32
    %c0_i32_0 = arith.constant 0 : i32
    %2 = arith.cmpi ne, %1, %c0_i32_0 : i32
    scf.if %2 {
      %cst_16 = arith.constant 0.000000e+00 : f32
      %25 = vector.broadcast %cst_16 : f32 to vector<4x2x128xf32>
      %c0_17 = arith.constant 0 : index
      %c0_18 = arith.constant 0 : index
      %c0_19 = arith.constant 0 : index
      %26 = vector.load %arg4[%c0_17, %c0_18, %c0_19] : memref<4x2x128xf32, #tpu.memory_space<vmem>>, vector<4x2x128xf32>
      tpu.vector_store %arg4[%c0_17, %c0_18, %c0_19], %25 {strides = array<i32>} : memref<4x2x128xf32, #tpu.memory_space<vmem>>, vector<4x2x128xf32>,
    } else {
    }
    %c0 = arith.constant 0 : index
    %c0_1 = arith.constant 0 : index
    %c0_2 = arith.constant 0 : index
    %c0_3 = arith.constant 0 : index
    %3 = vector.load %arg2[%c0, %c0_1, %c0_2, %c0_3] : memref<4x2x2x128xbf16, #tpu.memory_space<vmem>>, vector<4x2x2x128xbf16>
    %4 = arith.extf %3 : vector<4x2x2x128xbf16> to vector<4x2x2x128xf32>
    %c0_4 = arith.constant 0 : index
    %c0_5 = arith.constant 0 : index
    %c0_6 = arith.constant 0 : index
    %5 = vector.load %arg3[%c0_4, %c0_5, %c0_6] : memref<2x2x128xbf16, #tpu.memory_space<vmem>>, vector<2x2x128xbf16>
    %6 = arith.extf %5 : vector<2x2x128xbf16> to vector<2x2x128xf32>
    %7 = vector.shape_cast %6 : vector<2x2x128xf32> to vector<1x2x2x128xf32>
    %cst = arith.constant 0.000000e+00 : f32
    %8 = vector.broadcast %cst : f32 to vector<4x2x2x128xf32>
    %9 = arith.maximumf %4, %8 : vector<4x2x2x128xf32>
    %10 = vector.broadcast %7 : vector<1x2x2x128xf32> to vector<4x2x2x128xf32>
    %11 = arith.mulf %4, %10 : vector<4x2x2x128xf32>
    %12 = arith.subf %9, %11 : vector<4x2x2x128xf32>
    %13 = math.absf %4 : vector<4x2x2x128xf32>
    %cst_7 = arith.constant 0.000000e+00 : f32
    %14 = vector.broadcast %cst_7 : f32 to vector<4x2x2x128xf32>
    %15 = arith.subf %14, %13 : vector<4x2x2x128xf32>
    %16 = math.exp %15 : vector<4x2x2x128xf32>
    %17 = math.log1p %16 : vector<4x2x2x128xf32>
    %18 = arith.addf %12, %17 : vector<4x2x2x128xf32>
    %c0_8 = arith.constant 0 : index
    %c0_9 = arith.constant 0 : index
    %c0_10 = arith.constant 0 : index
    %19 = vector.load %arg4[%c0_8, %c0_9, %c0_10] : memref<4x2x128xf32, #tpu.memory_space<vmem>>, vector<4x2x128xf32>
    %cst_11 = arith.constant dense<0.000000e+00> : vector<4x2x128xf32>
    %20 = vector.multi_reduction <add>, %18, %cst_11 [2] : vector<4x2x2x128xf32> to vector<4x2x128xf32>
    %cst_12 = arith.constant 0.000000e+00 : f32
    %21 = vector.broadcast %cst_12 : f32 to vector<4x2x128xf32>
    %22 = arith.subf %21, %20 : vector<4x2x128xf32>
    %23 = arith.addf %19, %22 : vector<4x2x128xf32>
    %c0_13 = arith.constant 0 : index
    %c0_14 = arith.constant 0 : index
    %c0_15 = arith.constant 0 : index
    %24 = vector.load %arg4[%c0_13, %c0_14, %c0_15] : memref<4x2x128xf32, #tpu.memory_space<vmem>>, vector<4x2x128xf32>
    tpu.vector_store %arg4[%c0_13, %c0_14, %c0_15], %23 {strides = array<i32>} : memref<4x2x128xf32, #tpu.memory_space<vmem>>, vector<4x2x128xf32>,
    return
  }
  func.func @transform_0(%arg0: i32, %arg1: i32) -> (i32, i32, i32, i32) {
    %c0_i32 = arith.constant 0 : i32
    %c0_i32_0 = arith.constant 0 : i32
    %c0_i32_1 = arith.constant 0 : i32
    return %c0_i32, %arg0, %arg1, %c0_i32_0 : i32, i32, i32, i32
  }
  func.func @transform_1(%arg0: i32, %arg1: i32) -> (i32, i32, i32) {
    %c0_i32 = arith.constant 0 : i32
    %c0_i32_0 = arith.constant 0 : i32
    return %arg0, %arg1, %c0_i32 : i32, i32, i32
  }
  func.func @transform_2(%arg0: i32, %arg1: i32) -> (i32, i32, i32) {
    %c0_i32 = arith.constant 0 : i32
    %c0_i32_0 = arith.constant 0 : i32
    %c0_i32_1 = arith.constant 0 : i32
    return %c0_i32, %arg0, %c0_i32_0 : i32, i32, i32
  }
}

</mosaic_0001>

<bundles_post_ra>
// kernel: tpu_custom_call.1
= control target key start
LH: loop header
LB: loop body
LE: loop exit
PB: predicated region body
PF: predicated region fallthrough
CT: control target
= control target key end

     0   :  { %7 = vsyncpa [#allocation3], 0  ;;  %s554_s0 = inlined_call_operand.hbm [shape: bf16[4,2,2,128], index: 0, kind: input, shape index: {}]   ;;  %s555_s1 = inlined_call_operand.vmem [shape: bf16[2,2,128], index: 1, kind: input, shape index: {}]   ;;  %s556_s2 = inlined_call_operand.hbm [shape: f32[4,2,128], index: 2, kind: output, shape index: {}]  }
   0x1   :  { %8 = vsyncpa [#allocation4], 0  ;;  %s388_s9 = smov [#allocation2]   ;;  %s340_s13 = scalar_lea.hbm %s554_s0, 128 }
   0x2   :  { %s14_s10 = sshll.u32 %s388_s9, 4  ;;  %p341_p0 = scmp.ne.s32.totalorder %s554_s0, %s340_s13  ;;  %s15_s10 = int_to_ptr.vmem [resolvable:$true] %s14_s10 }
   0x3   :  { %p344_p1 = scmp.lt.u32.totalorder %s340_s13, %s554_s0 }
   0x5   :  { %p346_p2 = pnand %p344_p1, %p341_p0 }
   0x7   :  { %349 = shalt.err (!%p346_p2)
}
   0x8   :  { %s350_s18 = scalar_lea.vmem %s15_s10, 128  ;;  %p355_p4 = scmp.lt.s32.totalorder %s15_s10, %s15_s10 }
   0x9   :  { %p351_p3 = scmp.ne.s32.totalorder %s15_s10, %s350_s18  ;;  %p356_p5 = scmp.lt.s32.totalorder %s350_s18, %s350_s18 }
   0xb   :  { %p357_p6 = por %p356_p5, %p355_p4 }
   0xd   :  { %p358_p7 = pnand %p357_p6, %p351_p3 }
   0xf   :  { %361 = shalt.err (!%p358_p7)
}
  0x10   :  { %s389_s19 = smov 16   ;;  %s390_s20 = smov 1  }
  0x11   :  { %20 = dma.hbm_to_vmem [thread:$0]  %s554_s0, 128, %s15_s10, [#allocation3], %s389_s19, %s389_s19, %s390_s20  }
  0x12   :  { %384 = dma.done.wait [#allocation3], 128  }
  0x13   :  { %385 = vsyncadd [#allocation3], 4294967168  ;;  %v391_v0 = vmov 0.0   ;;  %v34_v1 = vld [vmem:[#allocation2] sm:$0x1]  ;;  %vm194_vm1 = vcmask 1041408  }
  0x14   :  { %30 = vst [vmem:[#allocation5] sm:$0x3] %v391_v0  ;;  %31 = vst [vmem:[#allocation5 + $0x2] sm:$0x3] %v391_v0  ;;  %v35_v2 = vld [vmem:[#allocation2 + $0x1] sm:$0x1]  ;;  %v42_v3 = vunpack.c.l.bf16 %v34_v1 }
  0x15   :  { %32 = vst [vmem:[#allocation5 + $0x4] sm:$0x3] %v391_v0  ;;  %33 = vst [vmem:[#allocation5 + $0x6] sm:$0x3] %v391_v0  ;;  %v43_v4 = vunpack.c.l.bf16 %v35_v2  ;;  %v36_v5 = vld [vmem:[#allocation2 + $0x2] sm:$0x1] }
  0x16   :  { %v37_v6 = vld [vmem:[#allocation2 + $0x3] sm:$0x1]  ;;  %v422_v7 = vunpack.c.l.bf16 %v36_v5  ;;  %v78_v8 = vand.u32 2147483647, %v42_v3  ;;  %v50_v9 = vld [vmem:[%s555_s1] sm:$0x1] }
  0x17   :  { %v79_v10 = vand.u32 2147483647, %v43_v4  ;;  %v427_v11 = vunpack.c.l.bf16 %v37_v6  ;;  %v38_v12 = vld [vmem:[#allocation2 + $0x4] sm:$0x1]  ;;  %v39_v15 = vld [vmem:[#allocation2 + $0x5] sm:$0x1]  ;;  %v52_v22 = vunpack.c.l.bf16 %v50_v9 }
  0x18   :  { %v86_v13 = vsub.f32 0.0, %v78_v8  ;;  %v80_v14 = vand.u32 2147483647, %v422_v7  ;;  %v51_v16 = vld [vmem:[%s555_s1 + $0x1] sm:$0x1]  ;;  %v434_v24 = vunpack.c.l.bf16 %v38_v12  ;;  %v436_v25 = vunpack.c.l.bf16 %v39_v15  ;;  %s392_s1 = smov [#allocation5]  }
  0x19   :  { %v87_v17 = vsub.f32 0.0, %v79_v10  ;;  %v40_v18 = vld [vmem:[#allocation2 + $0x6] sm:$0x1]  ;;  %v81_v20 = vand.u32 2147483647, %v427_v11  ;;  %v53_v26 = vunpack.c.l.bf16 %v51_v16  ;;  %v54_v33 = vmax.f32 %v42_v3, 0.0 }
  0x1a   :  { %v94_v19 = vmul.f32 1.442695, %v86_v13  ;;  %v88_v21 = vsub.f32 0.0, %v80_v14  ;;  %v41_v29 = vld [vmem:[#allocation2 + $0x7] sm:$0x1]  ;;  %v438_v30 = vunpack.c.l.bf16 %v40_v18  ;;  %v62_v34 = vmul.f32 %v52_v22, %v42_v3  ;;  %s289_s26 = sshll.u32 %s392_s1, 4  ;;  %s290_s26 = int_to_ptr.vmem [resolvable:$true] %s289_s26 }
  0x1b   :  { %v96_v23 = vmul.f32 1.442695, %v87_v17  ;;  %v89_v27 = vsub.f32 0.0, %v81_v20  ;;  %v82_v32 = vand.u32 2147483647, %v434_v24  ;;  %v442_v36 = vunpack.c.l.bf16 %v41_v29  ;;  %s362_s27 = scalar_lea.vmem %s290_s26, 128  ;;  %p367_p9 = scmp.lt.s32.totalorder %s290_s26, %s290_s26 }
  0x1c   :  { %308 = vpow2.f32 %v94_v19  ;;  %v98_v28 = vmul.f32 1.442695, %v88_v21  ;;  %v83_v35 = vand.u32 2147483647, %v436_v25  ;;  %v55_v37 = vmax.f32 %v43_v4, 0.0  ;;  %p363_p8 = scmp.ne.s32.totalorder %s290_s26, %s362_s27  ;;  %p368_p10 = scmp.lt.s32.totalorder %s362_s27, %s362_s27 }
  0x1d   :  { %310 = vpow2.f32 %v96_v23  ;;  %v100_v31 = vmul.f32 1.442695, %v89_v27  ;;  %v63_v38 = vmul.f32 %v53_v26, %v43_v4  ;;  %v90_v39 = vsub.f32 0.0, %v82_v32 }
  0x1e   :  { %312 = vpow2.f32 %v98_v28  ;;  %v91_v40 = vsub.f32 0.0, %v83_v35  ;;  %v84_v41 = vand.u32 2147483647, %v438_v30  ;;  %v85_v43 = vand.u32 2147483647, %v442_v36  ;;  %p369_p11 = por %p368_p10, %p367_p9 }
  0x1f   :  { %314 = vpow2.f32 %v100_v31  ;;  %v102_v42 = vmul.f32 1.442695, %v90_v39  ;;  %v446_v44 = vsub.f32 %v54_v33, %v62_v34  ;;  %v56_v45 = vmax.f32 %v422_v7, 0.0 }
  0x20   :  { %v104_v46 = vmul.f32 1.442695, %v91_v40  ;;  %v92_v47 = vsub.f32 0.0, %v84_v41  ;;  %v449_v48 = vsub.f32 %v55_v37, %v63_v38  ;;  %v64_v49 = vmul.f32 %v52_v22, %v422_v7  ;;  %p370_p12 = pnand %p369_p11, %p363_p8 }
  0x21   :  { %316 = vpow2.f32 %v102_v42  ;;  %v93_v50 = vsub.f32 0.0, %v85_v43  ;;  %v57_v51 = vmax.f32 %v427_v11, 0.0  ;;  %v65_v52 = vmul.f32 %v53_v26, %v427_v11 }
  0x22   :  { %318 = vpow2.f32 %v104_v46  ;;  %v106_v53 = vmul.f32 1.442695, %v92_v47  ;;  %v58_v55 = vmax.f32 %v434_v24, 0.0  ;;  %v59_v56 = vmax.f32 %v436_v25, 0.0 }
  0x23   :  { %v66_v57 = vmul.f32 %v52_v22, %v434_v24  ;;  %v108_v58 = vmul.f32 1.442695, %v93_v50  ;;  %v67_v61 = vmul.f32 %v53_v26, %v436_v25  ;;  %v60_v62 = vmax.f32 %v438_v30, 0.0 }
  0x24   :  { %320 = vpow2.f32 %v106_v53  ;;  %v61_v4 = vmax.f32 %v442_v36, 0.0  ;;  %v68_v5 = vmul.f32 %v52_v22, %v438_v30  ;;  %v69_v9 = vmul.f32 %v53_v26, %v442_v36 }
  0x25   :  { %322 = vpow2.f32 %v108_v58  ;;  %v462_v11 = vsub.f32 %v56_v45, %v64_v49  ;;  %v464_v15 = vsub.f32 %v57_v51, %v65_v52  ;;  %v466_v18 = vsub.f32 %v58_v55, %v66_v57 }
  0x26   :  { %v309_v54 = vpop.eup %308  ;;  %v468_v19 = vsub.f32 %v59_v56, %v67_v61  ;;  %v474_v23 = vsub.f32 %v60_v62, %v68_v5  ;;  %v476_v24 = vsub.f32 %v61_v4, %v69_v9  ;;  %vm267_vm9 = vcmask 1041409  }
  0x27   :  { %v311_v59 = vpop.eup %310  ;;  %v110_v60 = vadd.f32 1.0, %v309_v54  ;;  %v113_v0 = vmul.f32 -0.5, %v309_v54  ;;  %v116_v7 = vand.u32 2147483647, %v309_v54 }
  0x28   :  { %v313_v63 = vpop.eup %312  ;;  %v119_v1 = vadd.f32 1.0, %v311_v59  ;;  %v122_v2 = vmul.f32 -0.5, %v311_v59  ;;  %v125_v10 = vand.u32 2147483647, %v311_v59 }
  0x29   :  { %324 = vlog2.f32 %v110_v60  ;;  %v128_v3 = vadd.f32 1.0, %v313_v63  ;;  %v315_v6 = vpop.eup %314  ;;  %v131_v8 = vmul.f32 -0.5, %v313_v63  ;;  %v114_v13 = vadd.f32 1.0, %v113_v0 }
  0x2a   :  { %326 = vlog2.f32 %v119_v1  ;;  %v137_v12 = vadd.f32 1.0, %v315_v6  ;;  %v123_v14 = vadd.f32 1.0, %v122_v2  ;;  %v140_v16 = vmul.f32 -0.5, %v315_v6 }
  0x2b   :  { %328 = vlog2.f32 %v128_v3  ;;  %v134_v17 = vand.u32 2147483647, %v313_v63  ;;  %v317_v20 = vpop.eup %316  ;;  %vm470_vm0 = vcmp.lt.f32.partialorder %v116_v7, 0.0004427343  ;;  %v132_v22 = vadd.f32 1.0, %v131_v8 }
  0x2c   :  { %330 = vlog2.f32 %v137_v12  ;;  %v319_v25 = vpop.eup %318  ;;  %vm478_vm2 = vcmp.lt.f32.partialorder %v125_v10, 0.0004427343  ;;  %v143_v27 = vand.u32 2147483647, %v315_v6  ;;  %v146_v28 = vadd.f32 1.0, %v317_v20 }
  0x2d   :  { %v149_v29 = vmul.f32 -0.5, %v317_v20  ;;  %v115_v30 = vmul.f32 %v309_v54, %v114_v13  ;;  %v124_v31 = vmul.f32 %v311_v59, %v123_v14  ;;  %v141_v32 = vadd.f32 1.0, %v140_v16 }
  0x2e   :  { %v155_v33 = vadd.f32 1.0, %v319_v25  ;;  %v321_v34 = vpop.eup %320  ;;  %vm482_vm3 = vcmp.lt.f32.partialorder %v134_v17, 0.0004427343  ;;  %332 = vlog2.f32 %v146_v28  ;;  %v152_v36 = vand.u32 2147483647, %v317_v20 }
  0x2f   :  { %v158_v37 = vmul.f32 -0.5, %v319_v25  ;;  %v323_v38 = vpop.eup %322  ;;  %v133_v39 = vmul.f32 %v313_v63, %v132_v22  ;;  %v161_v40 = vand.u32 2147483647, %v319_v25  ;;  %v164_v41 = vadd.f32 1.0, %v321_v34 }
  0x30   :  { %334 = vlog2.f32 %v155_v33  ;;  %vm486_vm4 = vcmp.lt.f32.partialorder %v143_v27, 0.0004427343  ;;  %v150_v45 = vadd.f32 1.0, %v149_v29  ;;  %v167_v46 = vmul.f32 -0.5, %v321_v34 }
  0x31   :  { %v173_v47 = vadd.f32 1.0, %v323_v38  ;;  %v142_v51 = vmul.f32 %v315_v6, %v141_v32  ;;  %336 = vlog2.f32 %v164_v41  ;;  %v176_v52 = vmul.f32 -0.5, %v323_v38 }
  0x32   :  { %vm490_vm5 = vcmp.lt.f32.partialorder %v152_v36, 0.0004427343  ;;  %v159_v56 = vadd.f32 1.0, %v158_v37  ;;  %vm496_vm6 = vcmp.lt.f32.partialorder %v161_v40, 0.0004427343  ;;  %v151_v0 = vmul.f32 %v317_v20, %v150_v45 }
  0x33   :  { %v325_v42 = vpop.eup %324  ;;  %338 = vlog2.f32 %v173_v47  ;;  %v170_v60 = vand.u32 2147483647, %v321_v34  ;;  %v168_v1 = vadd.f32 1.0, %v167_v46  ;;  %v177_v5 = vadd.f32 1.0, %v176_v52 }
  0x34   :  { %v327_v49 = vpop.eup %326  ;;  %v112_v50 = vmul.f32 0.6931472, %v325_v42  ;;  %v160_v8 = vmul.f32 %v319_v25, %v159_v56  ;;  %v179_v9 = vand.u32 2147483647, %v323_v38 }
  0x35   :  { %v329_v53 = vpop.eup %328  ;;  %v121_v54 = vmul.f32 0.6931472, %v327_v49  ;;  %vm511_vm7 = vcmp.lt.f32.partialorder %v170_v60, 0.0004427343  ;;  %v169_v20 = vmul.f32 %v321_v34, %v168_v1  ;;  %v178_v26 = vmul.f32 %v323_v38, %v177_v5 }
  0x36   :  { %v118_v57 = vsel %vm470_vm0, %v115_v30, %v112_v50  ;;  %v130_v58 = vmul.f32 0.6931472, %v329_v53  ;;  %v331_v61 = vpop.eup %330  ;;  %vm518_vm8 = vcmp.lt.f32.partialorder %v179_v9, 0.0004427343 }
  0x37   :  { %v127_v62 = vsel %vm478_vm2, %v124_v31, %v121_v54  ;;  %v182_v63 = vadd.f32 %v118_v57, %v446_v44  ;;  %v139_v4 = vmul.f32 0.6931472, %v331_v61 }
  0x38   :  { %v183_v2 = vadd.f32 %v127_v62, %v449_v48  ;;  %v136_v3 = vsel %vm482_vm3, %v133_v39, %v130_v58  ;;  %v333_v48 = vpop.eup %332 }
  0x39   :  { %v195_v6 = vsel %vm194_vm1, %v182_v63, 0.0  ;;  %v184_v7 = vadd.f32 %v136_v3, %v462_v11  ;;  %v145_v44 = vsel %vm486_vm4, %v142_v51, %v139_v4  ;;  %v148_v25 = vmul.f32 0.6931472, %v333_v48  ;;  %v190_v4 = vld [vmem:[#allocation5] sm:$0x3] }
  0x3a   :  { %v196_v10 = vrot.slane %v195_v6, 4  ;;  %v202_v12 = vsel %vm194_vm1, %v183_v2, 0.0  ;;  %v185_v16 = vadd.f32 %v145_v44, %v464_v15  ;;  %v335_v11 = vpop.eup %334 }
  0x3b   :  { %v203_v14 = vrot.slane %v202_v12, 4  ;;  %v209_v17 = vsel %vm194_vm1, %v184_v7, 0.0  ;;  %v157_v29 = vmul.f32 0.6931472, %v335_v11  ;;  %v337_v31 = vpop.eup %336  ;;  %v154_v34 = vsel %vm490_vm5, %v151_v0, %v148_v25 }
  0x3c   :  { %v197_v21 = vadd.f32 %v196_v10, %v195_v6  ;;  %v210_v22 = vrot.slane %v209_v17, 4  ;;  %v216_v28 = vsel %vm194_vm1, %v185_v16, 0.0  ;;  %v186_v38 = vadd.f32 %v154_v34, %v466_v18  ;;  %v192_v34 = vld [vmem:[#allocation5 + $0x4] sm:$0x3] }
  0x3d   :  { %v204_v27 = vadd.f32 %v203_v14, %v202_v12  ;;  %v217_v33 = vrot.slane %v216_v28, 4  ;;  %v339_v35 = vpop.eup %338  ;;  %v163_v37 = vsel %vm496_vm6, %v160_v8, %v157_v29  ;;  %v166_v39 = vmul.f32 0.6931472, %v337_v31  ;;  %v191_v14 = vld [vmem:[#allocation5 + $0x2] sm:$0x3] }
  0x3e   :  { %v198_v32 = vrot.slane %v197_v21, 2  ;;  %v211_v15 = vadd.f32 %v210_v22, %v209_v17  ;;  %v187_v43 = vadd.f32 %v163_v37, %v468_v19  ;;  %v223_v46 = vsel %vm194_vm1, %v186_v38, 0.0 }
  0x3f   :  { %v205_v36 = vrot.slane %v204_v27, 2  ;;  %v218_v42 = vadd.f32 %v217_v33, %v216_v28  ;;  %v172_v47 = vsel %vm511_vm7, %v169_v20, %v166_v39  ;;  %v175_v49 = vmul.f32 0.6931472, %v339_v35 }
  0x40   :  { %v199_v40 = vadd.f32 %v198_v32, %v197_v21  ;;  %v212_v41 = vrot.slane %v211_v15, 2  ;;  %v224_v53 = vrot.slane %v223_v46, 4  ;;  %v230_v18 = vsel %vm194_vm1, %v187_v43, 0.0 }
  0x41   :  { %v206_v45 = vadd.f32 %v205_v36, %v204_v27  ;;  %v219_v52 = vrot.slane %v218_v42, 2  ;;  %v181_v55 = vsel %vm518_vm8, %v178_v26, %v175_v49  ;;  %v188_v56 = vadd.f32 %v172_v47, %v474_v23 }
  0x42   :  { %v200_v50 = vrot.slane %v199_v40, 1  ;;  %v213_v51 = vadd.f32 %v212_v41, %v211_v15  ;;  %v225_v59 = vadd.f32 %v224_v53, %v223_v46  ;;  %v231_v61 = vrot.slane %v230_v18, 4  ;;  %v193_v41 = vld [vmem:[#allocation5 + $0x6] sm:$0x3] }
  0x43   :  { %v207_v54 = vrot.slane %v206_v45, 1  ;;  %v220_v58 = vadd.f32 %v219_v52, %v218_v42  ;;  %v189_v62 = vadd.f32 %v181_v55, %v476_v24  ;;  %v237_v63 = vsel %vm194_vm1, %v188_v56, 0.0 }
  0x44   :  { %v201_v19 = vadd.f32 %v200_v50, %v199_v40  ;;  %v214_v57 = vrot.slane %v213_v51, 1  ;;  %v226_v3 = vrot.slane %v225_v59, 2  ;;  %v232_v6 = vadd.f32 %v231_v61, %v230_v18 }
  0x45   :  { %v208_v60 = vadd.f32 %v207_v54, %v206_v45  ;;  %v221_v2 = vrot.slane %v220_v58, 1  ;;  %v238_v7 = vrot.slane %v237_v63, 4  ;;  %v244_v23 = vsel %vm194_vm1, %v189_v62, 0.0 }
  0x46   :  { %v251_v0 = vsub.f32 0.0, %v201_v19  ;;  %v215_v1 = vadd.f32 %v214_v57, %v213_v51  ;;  %v227_v10 = vadd.f32 %v226_v3, %v225_v59  ;;  %v245_v12 = vrot.slane %v244_v23, 4 }
  0x47   :  { %v252_v5 = vsub.f32 0.0, %v208_v60  ;;  %v222_v8 = vadd.f32 %v221_v2, %v220_v58  ;;  %v233_v13 = vrot.slane %v232_v6, 2  ;;  %v239_v24 = vadd.f32 %v238_v7, %v237_v63 }
  0x48   :  { %v253_v9 = vsub.f32 0.0, %v215_v1  ;;  %v228_v17 = vrot.slane %v227_v10, 1  ;;  %v246_v20 = vadd.f32 %v245_v12, %v244_v23 }
  0x49   :  { %v268_v44 = vsel %vm267_vm9, %v252_v5, %v251_v0  ;;  %v254_v16 = vsub.f32 0.0, %v222_v8  ;;  %v234_v11 = vadd.f32 %v233_v13, %v232_v6  ;;  %v240_v21 = vrot.slane %v239_v24, 2 }
  0x4a   :  { %v276_v48 = vadd.f32 %v268_v44, %v190_v4  ;;  %v229_v25 = vadd.f32 %v228_v17, %v227_v10  ;;  %v247_v26 = vrot.slane %v246_v20, 2 }
  0x4b   :  { %v269_v22 = vsel %vm267_vm9, %v254_v16, %v253_v9  ;;  %v235_v28 = vrot.slane %v234_v11, 1  ;;  %v241_v29 = vadd.f32 %v240_v21, %v239_v24 }
  0x4c   :  { %280 = vst [vmem:[#allocation5] sm:$0x3] %v276_v48  ;;  %v277_v27 = vadd.f32 %v269_v22, %v191_v14  ;;  %v248_v30 = vadd.f32 %v247_v26, %v246_v20  ;;  %v255_v32 = vsub.f32 0.0, %v229_v25 }
  0x4d   :  { %v236_v31 = vadd.f32 %v235_v28, %v234_v11  ;;  %v242_v15 = vrot.slane %v241_v29, 1 }
  0x4e   :  { %281 = vst [vmem:[#allocation5 + $0x2] sm:$0x3] %v277_v27  ;;  %v249_v33 = vrot.slane %v248_v30, 1 }
  0x4f   :  { %v256_v35 = vsub.f32 0.0, %v236_v31  ;;  %v243_v36 = vadd.f32 %v242_v15, %v241_v29 }
  0x50   :  { %v250_v37 = vadd.f32 %v249_v33, %v248_v30 }
  0x51   :  { %v270_v38 = vsel %vm267_vm9, %v256_v35, %v255_v32  ;;  %v257_v39 = vsub.f32 0.0, %v243_v36 }
  0x52   :  { %v278_v40 = vadd.f32 %v270_v38, %v192_v34  ;;  %v258_v42 = vsub.f32 0.0, %v250_v37 }
  0x54   :  { %282 = vst [vmem:[#allocation5 + $0x4] sm:$0x3] %v278_v40  ;;  %v271_v43 = vsel %vm267_vm9, %v258_v42, %v257_v39 }
  0x55   :  { %v279_v45 = vadd.f32 %v271_v43, %v193_v41 }
  0x57   :  { %283 = vst [vmem:[#allocation5 + $0x6] sm:$0x3] %v279_v45 }
  0x58   :  { %373 = shalt.err (!%p370_p12)
}
  0x59   :  { %s374_s30 = scalar_lea.hbm %s556_s2, 128 }
  0x5a   :  { %p375_p13 = scmp.ne.s32.totalorder %s556_s2, %s374_s30  ;;  %p378_p0 = scmp.lt.u32.totalorder %s374_s30, %s556_s2 }
  0x5c   :  { %p380_p1 = pnand %p378_p0, %p375_p13 }
  0x5e   :  { %383 = shalt.err (!%p380_p1)
}
  0x5f   :  { %s393_s7 = smov 32   ;;  %s394_s8 = smov 2  }
  0x60   :  { %295 = dma.vmem_to_hbm [thread:$0]  %s290_s26, 128, %s556_s2, [#allocation4], %s393_s7, %s393_s7, %s394_s8  }
  0x61   :  { %386 = dma.done.wait [#allocation4], 128  }
  0x62   :  { %387 = vsyncadd [#allocation4], 4294967168 }
  0x63   :  { %299 = vsyncpa [#allocation3], 1 }
  0x64   :  { %300 = vsyncpa [#allocation4], 1 }

</bundles_post_ra>
